<compile_context>
chip_gen: v6e
topology: v6e:2x2x1
jax: 0.10.0
libtpu: 0.0.40
codegen_flags: <defaults>
</compile_context>

<pallas_src>
import functools
import math

import jax
import jax.numpy as jnp
from jax.experimental import pallas as pl
from jax.experimental.pallas import tpu as pltpu

N_CLASS = 10
BETA = 0.99


def _ry_constants(n_class):
    """Exact closed form of similarity_matrix(one_hot) incl. the 1e-8 eps + clamp."""
    c = float(n_class)
    hit, miss = 1.0 - 1.0 / c, -1.0 / c
    norm_sq = hit * hit + (c - 1.0) * miss * miss            # ||xc||^2 = (c-1)/c
    denom_sq = (1e-8 + math.sqrt(norm_sq)) ** 2
    same_val = min(1.0, norm_sq / denom_sq)                  # same label
    diff_val = max(-1.0, min(1.0, (2.0 * hit * miss + (c - 2.0) * miss * miss) / denom_sq))
    return same_val, diff_val


def _pick_tile(dim, preferred, align):
    """Largest tile <= preferred that divides dim and is a multiple of align;
    falls back to the full extent (always a legal block) otherwise."""
    if dim <= preferred:
        return dim
    t = (preferred // align) * align
    while t >= align:
        if dim % t == 0:
            return t
        t -= align
    # TODO(synk): pad / mask a tail tile instead of the full-extent fallback
    # (only matters for very large B with no aligned divisor).
    return dim


def _predsim_kernel(logits_ref, labels_r_ref, labels_c_ref, rh_ref,
                    out_ref, acc_ref, *, same_val, diff_val, beta, b_total):
    j = pl.program_id(1)          # col tile of Rh ("arbitrary" / accumulation axis)

    # ---- init per-row-tile accumulator on the first column tile ------------
    @pl.when(j == 0)
    def _init():
        acc_ref[...] = jnp.zeros_like(acc_ref)

    # ---- sim-loss contribution of this (tm, tn) tile of Rh -----------------
    lab_rows = labels_r_ref[...]                      # (tm, 1) int32, resident over j
    lab_cols = labels_c_ref[...]                      # (1, tn) int32, streamed per j
    # Closed-form Ry tile: VPU compare + select (no MXU, no transpose).
    ry = jnp.where(lab_rows == lab_cols,
                   jnp.float32(same_val), jnp.float32(diff_val))      # (tm, tn)
    diff = rh_ref[...].astype(jnp.float32) - ry
    # Sublane-only (axis 0) reduce per step; cross-lane reduce deferred to finalize.
    acc_ref[...] = acc_ref[...] + jnp.sum(diff * diff, axis=0, keepdims=True)

    # ---- finalize this row tile: sim partial + CE partial -------------------
    @pl.when(j == pl.num_programs(1) - 1)
    def _fin():
        sim_partial = jnp.sum(acc_ref[...]) * (beta / float(b_total * b_total))

        # Cross entropy for this row tile (logits/labels_r blocks are constant
        # across j, so they are valid here without extra DMA).
        logits = logits_ref[...].astype(jnp.float32)                  # (tm, C)
        tm, nc = logits.shape
        col = jax.lax.broadcasted_iota(jnp.int32, (tm, nc), 1)
        picked = jnp.sum(jnp.where(col == lab_rows, logits, 0.0),
                         axis=1, keepdims=True)                       # (tm, 1)
        m = jnp.max(logits, axis=1, keepdims=True)
        lse = m + jnp.log(jnp.sum(jnp.exp(logits - m), axis=1, keepdims=True))
        ce_partial = jnp.sum(lse - picked) * ((1.0 - beta) / float(b_total))

        total = sim_partial + ce_partial
        r = jax.lax.broadcasted_iota(jnp.int32, out_ref.shape, 0)
        c = jax.lax.broadcasted_iota(jnp.int32, out_ref.shape, 1)
        # Only [0, 0] carries the partial; zeros elsewhere -> wrapper does jnp.sum.
        out_ref[...] = jnp.where(jnp.logical_and(r == 0, c == 0), total, 0.0)


def predsim_loss(logits, rh, labels, *, n_class=N_CLASS, beta=BETA,
                 block_rows=1024, block_cols=1024):
    """logits: (B, C), rh: (B, B) (any float dtype, e.g. bf16), labels: (B,) int.

    On v5e/v6e, passing Rh in bf16 halves HBM traffic for the bandwidth-bound
    B x B sweep; arithmetic stays f32 in-kernel.
    """
    B, C = logits.shape
    assert rh.shape == (B, B)
    labels_r = labels.astype(jnp.int32).reshape(B, 1)   # row view (also CE labels)
    labels_c = labels.astype(jnp.int32).reshape(1, B)   # col view

    # dtype-aware sublane alignment for the Rh row tile: 8 f32 / 16 bf16 / 32 int8.
    itemsize = jnp.dtype(rh.dtype).itemsize
    row_align = 8 * max(1, 4 // itemsize)

    # Cap tm at B//2 (aligned) so gi >= 2 and the "parallel" row axis can split
    # across the v7x megacore (no-op on single-TC v5e/v6e).
    half = (B // 2 // row_align) * row_align
    row_pref = min(block_rows, half) if half >= row_align else B
    tm = _pick_tile(B, row_pref, row_align)
    tn = _pick_tile(B, block_cols, 128)
    gi, gj = B // tm, B // tn

    same_val, diff_val = _ry_constants(n_class)
    kernel = functools.partial(_predsim_kernel, same_val=same_val,
                               diff_val=diff_val, beta=beta, b_total=B)

    cost = pl.CostEstimate(
        flops=int(3 * B * B + 6 * B * C),
        transcendentals=int(B * C + B),
        bytes_accessed=int(B * B * rh.dtype.itemsize
                           + B * C * logits.dtype.itemsize
                           + 2 * B * 4 + gi * 8 * 128 * 4),
    )

    out = pl.pallas_call(
        kernel,
        out_shape=jax.ShapeDtypeStruct((gi * 8, 128), jnp.float32),
        grid_spec=pltpu.PrefetchScalarGridSpec(
            num_scalar_prefetch=0,
            grid=(gi, gj),
            in_specs=[
                pl.BlockSpec((tm, C), lambda i, j: (i, 0)),    # logits row tile
                pl.BlockSpec((tm, 1), lambda i, j: (i, 0)),    # labels row tile
                pl.BlockSpec((1, tn), lambda i, j: (0, j)),    # labels col tile
                pl.BlockSpec((tm, tn), lambda i, j: (i, j)),   # Rh tile (pipelined)
            ],
            out_specs=pl.BlockSpec((8, 128), lambda i, j: (i, 0)),
            scratch_shapes=[pltpu.VMEM((1, tn), jnp.float32)],  # lane-wide f32 acc
        ),
        compiler_params=pltpu.CompilerParams(
            dimension_semantics=("parallel", "arbitrary"),
            vmem_limit_bytes=32 * 1024 * 1024),                 # 1024-tiles use ~10 MiB
        cost_estimate=cost,
    )(logits, labels_r, labels_c, rh)

    # Per-row-tile partials already carry the (1-beta)/beta weights; sum them.
    return jnp.sum(out)


# ---------------------------- pure-JAX reference ----------------------------
def _similarity_matrix_ref(x):
    xc = x - jnp.mean(x, axis=1, keepdims=True)
    xn = xc / (1e-8 + jnp.sqrt(jnp.sum(xc ** 2, axis=1)))[:, None]
    return jnp.clip(xn @ xn.T, -1.0, 1.0)


def _predsim_loss_ref(logits, rh, labels):
    lse = jax.nn.logsumexp(logits, axis=1)
    picked = jnp.take_along_axis(logits, labels[:, None], axis=1)[:, 0]
    pred_loss = jnp.mean(lse - picked)
    y_onehot = jax.nn.one_hot(labels, N_CLASS, dtype=jnp.float32)
    ry = _similarity_matrix_ref(y_onehot)
    sim_loss = jnp.mean((rh.astype(jnp.float32) - ry) ** 2)
    return (1.0 - BETA) * pred_loss + BETA * sim_loss


if __name__ == "__main__":
    key = jax.random.PRNGKey(0)
    k1, k2, k3 = jax.random.split(key, 3)

    B = 128
    logits = jax.random.normal(k1, (B, N_CLASS), dtype=jnp.float32)
    labels = jax.random.randint(k2, (B,), 0, N_CLASS, dtype=jnp.int32)

    # Rh mimics the similarity matrix of some hidden features (glue, plain JAX).
    hidden = jax.random.normal(k3, (B, 32), dtype=jnp.float32)
    rh = _similarity_matrix_ref(hidden)

    # f32 path (tm = 64 -> gi = 2 row tiles, gj = 1 col tile at this B)
    loss = predsim_loss(logits, rh, labels)
    jax.block_until_ready(loss)
    ref = _predsim_loss_ref(logits, rh, labels)
    assert jnp.allclose(loss, ref, rtol=1e-5, atol=1e-5), (loss, ref)

    # bf16 Rh pass-through (native dtype, cast in-kernel — halves HBM traffic)
    rh_bf16 = rh.astype(jnp.bfloat16)
    loss_bf16 = predsim_loss(logits, rh_bf16, labels)
    jax.block_until_ready(loss_bf16)
    ref_bf16 = _predsim_loss_ref(logits, rh_bf16, labels)
    assert jnp.allclose(loss_bf16, ref_bf16, rtol=1e-4, atol=1e-4), (loss_bf16, ref_bf16)

    print("KERNEL_OK")
</pallas_src>

<mosaic_0001>
module attributes {stable_mosaic.version = 11 : i64} {
  func.func @_predsim_kernel(%arg0: i32, %arg1: i32, %arg2: memref<64x10xf32, #tpu.memory_space<vmem>>, %arg3: memref<64x1xi32, #tpu.memory_space<vmem>>, %arg4: memref<1x128xi32, #tpu.memory_space<vmem>>, %arg5: memref<64x128xf32, #tpu.memory_space<vmem>>, %arg6: memref<8x128xf32, #tpu.memory_space<vmem>>, %arg7: memref<1x128xf32, #tpu.memory_space<vmem>>) attributes {dimension_semantics = [#tpu.dimension_semantics<parallel>, #tpu.dimension_semantics<arbitrary>], iteration_bounds = array<i64: 2, 1>, scalar_prefetch = 0 : i64, scratch_operands = 1 : i64, tpu.core_type = #tpu.core_type<tc>, window_params = [{transform_indices = @transform_0, window_bounds = array<i64: 64, 10>}, {transform_indices = @transform_1, window_bounds = array<i64: 64, 1>}, {transform_indices = @transform_2, window_bounds = array<i64: 1, 128>}, {transform_indices = @transform_3, window_bounds = array<i64: 64, 128>}, {transform_indices = @transform_4, window_bounds = array<i64: 8, 128>}]} {
    %c0_i32 = arith.constant 0 : i32
    %0 = arith.cmpi eq, %arg1, %c0_i32 : i32
    %1 = arith.extui %0 : i1 to i32
    %c0_i32_0 = arith.constant 0 : i32
    %2 = arith.cmpi ne, %1, %c0_i32_0 : i32
    scf.if %2 {
      %cst_14 = arith.constant 0.000000e+00 : f32
      %22 = vector.broadcast %cst_14 : f32 to vector<1x128xf32>
      %c0_15 = arith.constant 0 : index
      %c0_16 = arith.constant 0 : index
      %23 = vector.load %arg7[%c0_15, %c0_16] : memref<1x128xf32, #tpu.memory_space<vmem>>, vector<1x128xf32>
      tpu.vector_store %arg7[%c0_15, %c0_16], %22 {strides = array<i32>} : memref<1x128xf32, #tpu.memory_space<vmem>>, vector<1x128xf32>,
    } else {
    }
    %c0 = arith.constant 0 : index
    %c0_1 = arith.constant 0 : index
    %3 = vector.load %arg3[%c0, %c0_1] : memref<64x1xi32, #tpu.memory_space<vmem>>, vector<64x1xi32>
    %c0_2 = arith.constant 0 : index
    %c0_3 = arith.constant 0 : index
    %4 = vector.load %arg4[%c0_2, %c0_3] : memref<1x128xi32, #tpu.memory_space<vmem>>, vector<1x128xi32>
    %5 = vector.broadcast %3 : vector<64x1xi32> to vector<64x128xi32>
    %6 = vector.broadcast %4 : vector<1x128xi32> to vector<64x128xi32>
    %7 = arith.cmpi eq, %5, %6 : vector<64x128xi32>
    %cst = arith.constant 1.000000e+00 : f32
    %cst_4 = arith.constant -0.111111112 : f32
    %8 = vector.broadcast %cst : f32 to vector<64x128xf32>
    %9 = vector.broadcast %cst_4 : f32 to vector<64x128xf32>
    %10 = arith.select %7, %8, %9 : vector<64x128xi1>, vector<64x128xf32>
    %c0_5 = arith.constant 0 : index
    %c0_6 = arith.constant 0 : index
    %11 = vector.load %arg5[%c0_5, %c0_6] : memref<64x128xf32, #tpu.memory_space<vmem>>, vector<64x128xf32>
    %12 = arith.subf %11, %10 : vector<64x128xf32>
    %c0_7 = arith.constant 0 : index
    %c0_8 = arith.constant 0 : index
    %13 = vector.load %arg7[%c0_7, %c0_8] : memref<1x128xf32, #tpu.memory_space<vmem>>, vector<1x128xf32>
    %14 = arith.mulf %12, %12 : vector<64x128xf32>
    %cst_9 = arith.constant dense<0.000000e+00> : vector<128xf32>
    %15 = vector.multi_reduction <add>, %14, %cst_9 [0] : vector<64x128xf32> to vector<128xf32>
    %16 = vector.shape_cast %15 : vector<128xf32> to vector<1x128xf32>
    %17 = arith.addf %13, %16 : vector<1x128xf32>
    %c0_10 = arith.constant 0 : index
    %c0_11 = arith.constant 0 : index
    %18 = vector.load %arg7[%c0_10, %c0_11] : memref<1x128xf32, #tpu.memory_space<vmem>>, vector<1x128xf32>
    tpu.vector_store %arg7[%c0_10, %c0_11], %17 {strides = array<i32>} : memref<1x128xf32, #tpu.memory_space<vmem>>, vector<1x128xf32>,
    %c0_i32_12 = arith.constant 0 : i32
    %19 = arith.cmpi eq, %arg1, %c0_i32_12 : i32
    %20 = arith.extui %19 : i1 to i32
    %c0_i32_13 = arith.constant 0 : i32
    %21 = arith.cmpi ne, %20, %c0_i32_13 : i32
    scf.if %21 {
      %c0_14 = arith.constant 0 : index
      %c0_15 = arith.constant 0 : index
      %22 = vector.load %arg7[%c0_14, %c0_15] : memref<1x128xf32, #tpu.memory_space<vmem>>, vector<1x128xf32>
      %23 = vector.shape_cast %22 : vector<1x128xf32> to vector<1x1x128xf32>
      %cst_16 = arith.constant dense<0.000000e+00> : vector<1xf32>
      %24 = vector.multi_reduction <add>, %23, %cst_16 [1, 2] : vector<1x1x128xf32> to vector<1xf32>
      %25 = vector.shape_cast %24 : vector<1xf32> to vector<1x1x1xf32>
      %26 = vector.extract %25[0, 0, 0] : f32 from vector<1x1x1xf32>
      %cst_17 = arith.constant 6.04248053E-5 : f32
      %27 = arith.mulf %26, %cst_17 : f32
      %c0_18 = arith.constant 0 : index
      %c0_19 = arith.constant 0 : index
      %28 = vector.load %arg2[%c0_18, %c0_19] : memref<64x10xf32, #tpu.memory_space<vmem>>, vector<64x10xf32>
      %29 = tpu.iota {dimensions = array<i32: 1>} : vector<64x10xi32>
      %30 = vector.broadcast %3 : vector<64x1xi32> to vector<64x10xi32>
      %31 = arith.cmpi eq, %29, %30 : vector<64x10xi32>
      %cst_20 = arith.constant 0.000000e+00 : f32
      %32 = vector.broadcast %cst_20 : f32 to vector<64x10xf32>
      %33 = arith.select %31, %28, %32 : vector<64x10xi1>, vector<64x10xf32>
      %cst_21 = arith.constant dense<0.000000e+00> : vector<64xf32>
      %34 = vector.multi_reduction <add>, %33, %cst_21 [1] : vector<64x10xf32> to vector<64xf32>
      %35 = vector.shape_cast %34 : vector<64xf32> to vector<64x1xf32>
      %cst_22 = arith.constant dense<0xFF800000> : vector<64xf32>
      %36 = vector.multi_reduction <maximumf>, %28, %cst_22 [1] : vector<64x10xf32> to vector<64xf32>
      %37 = vector.shape_cast %36 : vector<64xf32> to vector<64x1xf32>
      %38 = vector.broadcast %37 : vector<64x1xf32> to vector<64x10xf32>
      %39 = arith.subf %28, %38 : vector<64x10xf32>
      %40 = math.exp %39 : vector<64x10xf32>
      %cst_23 = arith.constant dense<0.000000e+00> : vector<64xf32>
      %41 = vector.multi_reduction <add>, %40, %cst_23 [1] : vector<64x10xf32> to vector<64xf32>
      %42 = vector.shape_cast %41 : vector<64xf32> to vector<64x1xf32>
      %43 = math.log %42 : vector<64x1xf32>
      %44 = arith.addf %37, %43 : vector<64x1xf32>
      %45 = arith.subf %44, %35 : vector<64x1xf32>
      %46 = vector.shape_cast %45 : vector<64x1xf32> to vector<1x64x1xf32>
      %cst_24 = arith.constant dense<0.000000e+00> : vector<1xf32>
      %47 = vector.multi_reduction <add>, %46, %cst_24 [1, 2] : vector<1x64x1xf32> to vector<1xf32>
      %48 = vector.shape_cast %47 : vector<1xf32> to vector<1x1x1xf32>
      %49 = vector.extract %48[0, 0, 0] : f32 from vector<1x1x1xf32>
      %cst_25 = arith.constant 7.812500e-05 : f32
      %50 = arith.mulf %49, %cst_25 : f32
      %51 = arith.addf %27, %50 : f32
      %52 = tpu.iota {dimensions = array<i32: 0>} : vector<8x128xi32>
      %53 = tpu.iota {dimensions = array<i32: 1>} : vector<8x128xi32>
      %c0_i32_26 = arith.constant 0 : i32
      %54 = vector.broadcast %c0_i32_26 : i32 to vector<8x128xi32>
      %55 = arith.cmpi eq, %52, %54 : vector<8x128xi32>
      %c0_i32_27 = arith.constant 0 : i32
      %56 = vector.broadcast %c0_i32_27 : i32 to vector<8x128xi32>
      %57 = arith.cmpi eq, %53, %56 : vector<8x128xi32>
      %58 = arith.andi %55, %57 : vector<8x128xi1>
      %cst_28 = arith.constant 0.000000e+00 : f32
      %59 = vector.broadcast %51 : f32 to vector<8x128xf32>
      %60 = vector.broadcast %cst_28 : f32 to vector<8x128xf32>
      %61 = arith.select %58, %59, %60 : vector<8x128xi1>, vector<8x128xf32>
      %c0_29 = arith.constant 0 : index
      %c0_30 = arith.constant 0 : index
      %62 = vector.load %arg6[%c0_29, %c0_30] : memref<8x128xf32, #tpu.memory_space<vmem>>, vector<8x128xf32>
      tpu.vector_store %arg6[%c0_29, %c0_30], %61 {strides = array<i32>} : memref<8x128xf32, #tpu.memory_space<vmem>>, vector<8x128xf32>,
    } else {
    }
    return
  }
  func.func @transform_0(%arg0: i32, %arg1: i32) -> (i32, i32) {
    %c0_i32 = arith.constant 0 : i32
    %c0_i32_0 = arith.constant 0 : i32
    return %arg0, %c0_i32 : i32, i32
  }
  func.func @transform_1(%arg0: i32, %arg1: i32) -> (i32, i32) {
    %c0_i32 = arith.constant 0 : i32
    %c0_i32_0 = arith.constant 0 : i32
    return %arg0, %c0_i32 : i32, i32
  }
  func.func @transform_2(%arg0: i32, %arg1: i32) -> (i32, i32) {
    %c0_i32 = arith.constant 0 : i32
    %c0_i32_0 = arith.constant 0 : i32
    return %c0_i32, %arg1 : i32, i32
  }
  func.func @transform_3(%arg0: i32, %arg1: i32) -> (i32, i32) {
    %c0_i32 = arith.constant 0 : i32
    return %arg0, %arg1 : i32, i32
  }
  func.func @transform_4(%arg0: i32, %arg1: i32) -> (i32, i32) {
    %c0_i32 = arith.constant 0 : i32
    %c0_i32_0 = arith.constant 0 : i32
    return %arg0, %c0_i32 : i32, i32
  }
}

</mosaic_0001>

<bundles_post_ra>
// kernel: tpu_custom_call.1
= control target key start
LH: loop header
LB: loop body
LE: loop exit
PB: predicated region body
PF: predicated region fallthrough
CT: control target
= control target key end

     0   :  { %9 = vsyncpa [#allocation4], 0  ;;  %s1199_s0 = inlined_call_operand.vmem [shape: f32[128,10], index: 0, kind: input, shape index: {}]   ;;  %s1200_s1 = inlined_call_operand.vmem [shape: s32[128,1], index: 1, kind: input, shape index: {}]   ;;  %s1201_s2 = inlined_call_operand.vmem [shape: s32[1,128], index: 2, kind: input, shape index: {}]   ;;  %s1202_s3 = inlined_call_operand.vmem [shape: f32[128,128], index: 3, kind: input, shape index: {}]   ;;  %s1203_s4 = inlined_call_operand.hbm [shape: f32[16,128], index: 4, kind: output, shape index: {}]  }
   0x1   :  { %11 = vsyncpa [#allocation4 + $0x1], 0  ;;  %s924_s15 = smov 0   ;;  %s926_s16 = smov 0  }
   0x2   :  { %s928_s17 = smov 0   ;;  %s930_s18 = smov 0  }
   0x3   :  { %s932_s19 = smov 0   ;;  %s934_s20 = smov 0  }
   0x4 LB: > { %s703_s21 = sadd.s32 4294967295, %s893_s20   ;;  %s704_s22 = sadd.s32 4294967294, %s893_s20   ;;  %s893_s20 = sphi %s934_s20, %s17_s20   ;;  %s889_s19 = sphi %s932_s19, %s1210_s19   ;;  %s885_s18 = sphi %s930_s18, %s1209_s18   ;;  %s881_s17 = sphi %s928_s17, %s1208_s17   ;;  %s877_s16 = sphi %s926_s16, %s1207_s16   ;;  %s873_s15 = sphi %s924_s15, %s1206_s15  }
   0x5   : > { %s29_s23 = sadd.s32 1, %s889_s19  ;;  %s142_s24 = sadd.s32 1, %s881_s17 }
   0x6   : > { %p31_p0 = scmp.ge.s32.totalorder %s29_s23, 2  ;;  %p152_p1 = scmp.ne.s32.totalorder %s881_s17, %s877_s16 }
   0x7   : > { %p153_p2 = scmp.eq.s32.totalorder %s703_s21, 1  ;;  %p158_p3 = scmp.ne.s32.totalorder %s877_s16, %s873_s15 }
   0x8   : > { %s1212_s23 = smov (%p31_p0, %s29_s23), 0  ;;  %p159_p5 = scmp.eq.s32.totalorder %s704_s22, 1 }
   0x9   : > { %p964_p4 = por %p153_p2, %p152_p1  ;;  %s139_s26 = ssub.s32 %s889_s19, %s1212_s23 }
   0xa   : > { %p708_p6 = scmp.ge.s32.totalorder %s893_s20, 1  ;;  %p140_p7 = scmp.eq.s32.totalorder %s139_s26, 0 }
   0xb   : > { %p971_p8 = por %p159_p5, %p158_p3  ;;  %p213_p9 = scmp.lt.s32.totalorder %s893_s20, 3 }
   0xc   : > { %s977_s28 = scalar_select %p140_p7, %s881_s17, %s142_s24  }
   0xd   : > { %p214_p10 = pnand %p708_p6, %p213_p9 }
   0xe   : > { %s710_s29 = sshll.u32 (!%p214_p10), %s885_s18, 3  ;;  %s252_s22 = sand.u32 (!%p214_p10), 1, %s877_s16  }
   0xf   : > { %217 = sbr.rel (%p214_p10) target bundleno = 581 (0x245), region = 36  ;;  %p256_p11 = scmp.lt.s32.totalorder (!%p214_p10), %s710_s29, 15 }
  0x10   : > { %s709_s24 = sshll.u32 (!%p214_p10), %s252_s22, 3  ;;  %s718_s6 = sshll.u32 (!%p214_p10), %s885_s18, 7 }
  0x11   : > { %s1159_s12 = scalar_lea.hbm (!%p214_p10), %s1203_s4, %s718_s6  ;;  %s584_s13 = scalar_lea.sflag (!%p214_p10), [#allocation4], %s252_s22 }
  0x12   : > { %s898_s18 = smov (!%p214_p10), [#allocation3]  }
  0x14   : > { %v895_v0 = vmov 0   ;;  %s1214_s29 = smov (!%p256_p11, %s710_s29), 15  ;;  %vm419_vm0 = vcmask 80896   ;;  %v896_v25 = vmov 0.0   ;;  %v1057_v48 = vld [vmem:[%s1201_s2] ss:$0 sm:$0xff]  ;;  %v401_v56 = vlaneseq }
  0x15   : > { %784 = vset.pattern.permute.xlu1 %v895_v0  ;;  %783 = vset.pattern.permute.xlu0 %v895_v0  ;;  %s980_s30 = sshll.u32 %s1214_s29, 3  ;;  %283 = vst [vmem:[#allocation2] sm:$0x1] %v896_v25  ;;  %v897_v53 = vmov -0.11111111  }
  0x16   : > { %s259_s7 = scalar_lea.vmem %s1199_s0, %s980_s30  ;;  %s265_s10 = scalar_lea.vmem %s1200_s1, %s980_s30 }
  0x17   : > { %v986_v1 = vld [vmem:[%s259_s7 + $0x10] sm:$0xff]  ;;  %v988_v2 = vld [vmem:[%s259_s7] sm:$0xff]  ;;  %v990_v3 = vld [vmem:[%s259_s7 + $0x18] sm:$0xff]  ;;  %s1063_s21 = scalar_lea.vmem %s1202_s3, %s980_s30 }
  0x18   : > { %v450_v4 = vsel %vm419_vm0, %v986_v1, -inf  ;;  %v444_v5 = vsel %vm419_vm0, %v988_v2, -inf  ;;  %v996_v6 = vld [vmem:[%s259_s7 + $0x8] sm:$0xff]  ;;  %v453_v7 = vsel %vm419_vm0, %v990_v3, -inf  ;;  %v1004_v10 = vld [vmem:[%s259_s7 + $0x20] sm:$0xff]  ;;  %v1010_v13 = vld [vmem:[%s259_s7 + $0x38] sm:$0xff] }
  0x19   : > { %451 = vmax.xlane.f32.xlu1 %v450_v4  ;;  %445 = vmax.xlane.f32.xlu0 %v444_v5  ;;  %v447_v8 = vsel %vm419_vm0, %v996_v6, -inf  ;;  %v1002_v9 = vld [vmem:[%s259_s7 + $0x28] sm:$0xff]  ;;  %v456_v12 = vsel %vm419_vm0, %v1004_v10, -inf  ;;  %v1012_v14 = vld [vmem:[%s259_s7 + $0x30] sm:$0xff]  ;;  %v465_v15 = vsel %vm419_vm0, %v1010_v13, -inf  ;;  %v284_v19 = vld [vmem:[%s265_s10] sm:$0xff] }
  0x1a   : > { %v459_v11 = vsel %vm419_vm0, %v1002_v9, -inf  ;;  %v462_v16 = vsel %vm419_vm0, %v1012_v14, -inf  ;;  %v285_v17 = vld [vmem:[%s265_s10 + $0x8] sm:$0xff]  ;;  %v286_v18 = vld [vmem:[%s265_s10 + $0x10] sm:$0xff]  ;;  %v287_v20 = vld [vmem:[%s265_s10 + $0x18] sm:$0xff]  ;;  %s254_s7 = scalar_lea.vmem [#allocation3], %s709_s24 }
  0x1b   : > { %v288_v21 = vld [vmem:[%s265_s10 + $0x20] sm:$0xff]  ;;  %v289_v22 = vld [vmem:[%s265_s10 + $0x28] sm:$0xff]  ;;  %v290_v23 = vld [vmem:[%s265_s10 + $0x30] sm:$0xff]  ;;  %s597_s8 = sshll.u32 %s254_s7, 4  ;;  %s598_s8 = int_to_ptr.vmem [resolvable:$true] %s597_s8 }
  0x1c   : > { %v291_v24 = vld [vmem:[%s265_s10 + $0x38] sm:$0xff]  ;;  %v338_v52 = vld [vmem:[%s1063_s21 + $0x8] sm:$0xff]  ;;  %v337_v59 = vld [vmem:[%s1063_s21] sm:$0xff]  ;;  %s817_s14 = scalar_lea.vmem %s598_s8, 128 }
  0x1d   : > { %454 = vmax.xlane.f32.xlu1 %v453_v7  ;;  %448 = vmax.xlane.f32.xlu0 %v447_v8  ;;  %v339_v63 = vld [vmem:[%s1063_s21 + $0x10] sm:$0xff]  ;;  %p818_p12 = scmp.ne.s32.totalorder %s598_s8, %s817_s14 }
  0x1f   : > { %p819_p13 = pnand %p818_p12, %p964_p4 }
  0x21   : > { %460 = vmax.xlane.f32.xlu1 %v459_v11  ;;  %457 = vmax.xlane.f32.xlu0 %v456_v12  ;;  %v1080_v11 = vand.u32 127, %v401_v56  ;;  %p820_p0 = pneg %p819_p13 }
  0x25   : > { %466 = vmax.xlane.f32.xlu1 %v465_v15  ;;  %463 = vmax.xlane.f32.xlu0 %v462_v16 }
  0x36   : > { %297 = vperm.xlu1 %784, %v285_v17  }
  0x3a   : > { %300 = vperm.xlu1 %784, %v286_v18  }
  0x3b   : > { %294 = vperm.xlu0 %783, %v284_v19  }
  0x3e   : > { %303 = vperm.xlu1 %784, %v287_v20  }
  0x42   : > { %306 = vperm.xlu1 %784, %v288_v21   ;;  %v340_v21 = vld [vmem:[%s1063_s21 + $0x18] sm:$0xff] }
  0x46   : > { %309 = vperm.xlu1 %784, %v289_v22  }
  0x4a   : > { %312 = vperm.xlu1 %784, %v290_v23  }
  0x4e   : > { %315 = vperm.xlu1 %784, %v291_v24  }
  0xa2   : > { %v1022_v26 = vpop.xlane.xlu1 %451  ;;  %v1024_v27 = vpop.xlane.xlu0 %445 }
  0xa3   : > { %v468_v28 = vsub.f32 %v988_v2, %v1024_v27  ;;  %v470_v30 = vsub.f32 %v986_v1, %v1022_v26 }
  0xa5   : > { %v476_v29 = vmul.f32 1.442695, %v468_v28  ;;  %v480_v37 = vmul.f32 1.442695, %v470_v30 }
  0xa6   : > { %v1030_v31 = vpop.xlane.xlu1 %454  ;;  %v1032_v32 = vpop.xlane.xlu0 %448 }
  0xa7   : > { %v471_v33 = vsub.f32 %v990_v3, %v1030_v31  ;;  %v469_v34 = vsub.f32 %v996_v6, %v1032_v32  ;;  %785 = vpow2.f32 %v476_v29 }
  0xa9   : > { %v482_v35 = vmul.f32 1.442695, %v471_v33  ;;  %v478_v36 = vmul.f32 1.442695, %v469_v34 }
  0xaa   : > { %v1038_v38 = vpop.xlane.xlu1 %460  ;;  %v1040_v39 = vpop.xlane.xlu0 %457 }
  0xab   : > { %787 = vpow2.f32 %v482_v35  ;;  %v473_v40 = vsub.f32 %v1002_v9, %v1038_v38  ;;  %v472_v41 = vsub.f32 %v1004_v10, %v1040_v39  ;;  %v341_v35 = vld [vmem:[%s1063_s21 + $0x20] sm:$0xff] }
  0xac   : > { %789 = vpow2.f32 %v478_v36 }
  0xad   : > { %v486_v42 = vmul.f32 1.442695, %v473_v40  ;;  %v484_v43 = vmul.f32 1.442695, %v472_v41  ;;  %791 = vpow2.f32 %v480_v37 }
  0xae   : > { %v1046_v44 = vpop.xlane.xlu1 %466  ;;  %v1048_v45 = vpop.xlane.xlu0 %463 }
  0xaf   : > { %793 = vpow2.f32 %v486_v42  ;;  %v475_v46 = vsub.f32 %v1010_v13, %v1046_v44  ;;  %v474_v47 = vsub.f32 %v1012_v14, %v1048_v45  ;;  %v342_v42 = vld [vmem:[%s1063_s21 + $0x28] sm:$0xff] }
  0xb0   : > { %795 = vpow2.f32 %v484_v43 }
  0xb1   : > { %v490_v49 = vmul.f32 1.442695, %v475_v46  ;;  %v488_v50 = vmul.f32 1.442695, %v474_v47 }
  0xb2   : > { %v298_v51 = vpop.permute.xlu1 %297 }
  0xb3   : > { %797 = vpow2.f32 %v490_v49  ;;  %vm322_vm1 = vcmp.eq.s32.totalorder %v298_v51, %v1057_v48  ;;  %vm404_vm5 = vcmp.eq.s32.totalorder %v1080_v11, %v298_v51 }
  0xb4   : > { %v330_v54 = vsel %vm322_vm1, 1.0, %v897_v53  ;;  %v786_v55 = vpop.eup %785  ;;  %799 = vpow2.f32 %v488_v50  ;;  %v412_v46 = vsel %vm404_vm5, %v996_v6, 0.0 }
  0xb5   : > { %v492_v58 = vsel %vm419_vm0, %v786_v55, 0.0  ;;  %v346_v61 = vsub.f32 %v338_v52, %v330_v54  ;;  %v423_v51 = vsel %vm419_vm0, %v412_v46, 0.0 }
  0xb6   : > { %v1068_v57 = vpop.permute.xlu1 %300  ;;  %v295_v60 = vpop.permute.xlu0 %294  ;;  %493 = vadd.xlane.f32.xlu1 %v492_v58  ;;  %v343_v58 = vld [vmem:[%s1063_s21 + $0x30] sm:$0xff] }
  0xb7   : > { %vm323_vm2 = vcmp.eq.s32.totalorder %v1068_v57, %v1057_v48  ;;  %vm321_vm3 = vcmp.eq.s32.totalorder %v295_v60, %v1057_v48  ;;  %v355_v17 = vmul.f32 %v346_v61, %v346_v61  ;;  %vm403_vm7 = vcmp.eq.s32.totalorder %v1080_v11, %v295_v60 }
  0xb8   : > { %v788_v62 = vpop.eup %787  ;;  %v331_v0 = vsel %vm323_vm2, 1.0, %v897_v53  ;;  %v329_v4 = vsel %vm321_vm3, 1.0, %v897_v53  ;;  %v411_v6 = vsel %vm403_vm7, %v988_v2, 0.0  ;;  %vm405_vm12 = vcmp.eq.s32.totalorder %v1080_v11, %v1068_v57  ;;  %v344_v2 = vld [vmem:[%s1063_s21 + $0x38] sm:$0xff]  ;;  %s821_s21 = sshll.u32 %s898_s18, 4  ;;  %s822_s21 = int_to_ptr.vmem [resolvable:$false] %s821_s21 }
  0xb9   : > { %v790_v5 = vpop.eup %789  ;;  %v345_v7 = vsub.f32 %v337_v59, %v329_v4  ;;  %v501_v8 = vsel %vm419_vm0, %v788_v62, 0.0  ;;  %v347_v18 = vsub.f32 %v339_v63, %v331_v0  ;;  %v420_v60 = vsel %vm419_vm0, %v411_v6, 0.0  ;;  %s823_s24 = scalar_lea.vmem %s822_s21, 256  ;;  %p824_p1 = scmp.lt.s32.totalorder %s598_s8, %s822_s21 }
  0xba   : > { %v304_v12 = vpop.permute.xlu1 %303  ;;  %v495_v15 = vsel %vm419_vm0, %v790_v5, 0.0  ;;  %v792_v16 = vpop.eup %791  ;;  %502 = vadd.xlane.f32.xlu1 %v501_v8  ;;  %v413_v57 = vsel %vm405_vm12, %v986_v1, 0.0  ;;  %vm381_vm2 = vcmask 1040384   ;;  %p825_p2 = scmp.lt.s32.totalorder %s823_s24, %s817_s14 }
  0xbb   : > { %v354_v19 = vmul.f32 %v345_v7, %v345_v7  ;;  %vm324_vm4 = vcmp.eq.s32.totalorder %v304_v12, %v1057_v48  ;;  %496 = vadd.xlane.f32.xlu0 %v495_v15  ;;  %v498_v28 = vsel %vm419_vm0, %v792_v16, 0.0  ;;  %v356_v29 = vmul.f32 %v347_v18, %v347_v18 }
  0xbc   : > { %v794_v20 = vpop.eup %793  ;;  %v332_v22 = vsel %vm324_vm4, 1.0, %v897_v53  ;;  %vm406_vm9 = vcmp.eq.s32.totalorder %v1080_v11, %v304_v12  ;;  %vm578_vm4 = vcmp.eq.s32.totalorder %v1080_v11, 0  ;;  %p826_p3 = por %p825_p2, %p824_p1 }
  0xbd   : > { %v507_v23 = vsel %vm419_vm0, %v794_v20, 0.0  ;;  %v796_v24 = vpop.eup %795  ;;  %v362_v30 = vadd.f32 %v355_v17, %v354_v19  ;;  %v348_v33 = vsub.f32 %v340_v21, %v332_v22  ;;  %v414_v63 = vsel %vm406_vm9, %v990_v3, 0.0 }
  0xbe   : > { %v1088_v25 = vpop.permute.xlu1 %306  ;;  %508 = vadd.xlane.f32.xlu1 %v507_v23  ;;  %v504_v40 = vsel %vm419_vm0, %v796_v24, 0.0  ;;  %v429_v8 = vsel %vm419_vm0, %v414_v63, 0.0  ;;  %p827_p5 = pnand %p826_p3, %p820_p0 }
  0xbf   : > { %vm325_vm6 = vcmp.eq.s32.totalorder %v1088_v25, %v1057_v48  ;;  %499 = vadd.xlane.f32.xlu0 %v498_v28  ;;  %v357_v47 = vmul.f32 %v348_v33, %v348_v33  ;;  %v363_v49 = vadd.f32 %v362_v30, %v356_v29  ;;  %vm407_vm15 = vcmp.eq.s32.totalorder %v1080_v11, %v1088_v25 }
  0xc0   : > { %v798_v34 = vpop.eup %797  ;;  %v333_v36 = vsel %vm325_vm6, 1.0, %v897_v53 }
  0xc1   : > { %v513_v37 = vsel %vm419_vm0, %v798_v34, 0.0  ;;  %v800_v41 = vpop.eup %799  ;;  %v349_v50 = vsub.f32 %v341_v35, %v333_v36  ;;  %v364_v61 = vadd.f32 %v363_v49, %v357_v47 }
  0xc2   : > { %v310_v43 = vpop.permute.xlu1 %309  ;;  %514 = vadd.xlane.f32.xlu1 %v513_v37  ;;  %v510_v55 = vsel %vm419_vm0, %v800_v41, 0.0 }
  0xc3   : > { %vm326_vm8 = vcmp.eq.s32.totalorder %v310_v43, %v1057_v48  ;;  %505 = vadd.xlane.f32.xlu0 %v504_v40  ;;  %v358_v62 = vmul.f32 %v349_v50, %v349_v50  ;;  %vm408_vm11 = vcmp.eq.s32.totalorder %v1080_v11, %v310_v43 }
  0xc4   : > { %v334_v52 = vsel %vm326_vm8, 1.0, %v897_v53  ;;  %v416_v3 = vsel %vm408_vm11, %v1002_v9, 0.0 }
  0xc5   : > { %v350_v54 = vsub.f32 %v342_v42, %v334_v52  ;;  %v365_v12 = vadd.f32 %v364_v61, %v358_v62  ;;  %v435_v19 = vsel %vm419_vm0, %v416_v3, 0.0 }
  0xc6   : > { %v313_v59 = vpop.permute.xlu1 %312  ;;  %424 = vadd.xlane.f32.xlu1 %v423_v51 }
  0xc7   : > { %vm327_vm10 = vcmp.eq.s32.totalorder %v313_v59, %v1057_v48  ;;  %511 = vadd.xlane.f32.xlu0 %v510_v55  ;;  %v359_v4 = vmul.f32 %v350_v54, %v350_v54  ;;  %vm409_vm1 = vcmp.eq.s32.totalorder %v1080_v11, %v313_v59 }
  0xc8   : > { %v335_v0 = vsel %vm327_vm10, 1.0, %v897_v53  ;;  %v417_v25 = vsel %vm409_vm1, %v1012_v14, 0.0 }
  0xc9   : > { %v351_v5 = vsub.f32 %v343_v58, %v335_v0  ;;  %v366_v17 = vadd.f32 %v365_v12, %v359_v4  ;;  %v438_v30 = vsel %vm419_vm0, %v417_v25, 0.0 }
  0xca   : > { %v316_v7 = vpop.permute.xlu1 %315  ;;  %430 = vadd.xlane.f32.xlu1 %v429_v8 }
  0xcb   : > { %v360_v15 = vmul.f32 %v351_v5, %v351_v5  ;;  %vm328_vm13 = vcmp.eq.s32.totalorder %v316_v7, %v1057_v48  ;;  %vm410_vm14 = vcmp.eq.s32.totalorder %v1080_v11, %v316_v7  ;;  %421 = vadd.xlane.f32.xlu0 %v420_v60  ;;  %v426_v48 = vsel %vm419_vm0, %v413_v57, 0.0 }
  0xcc   : > { %v336_v16 = vsel %vm328_vm13, 1.0, %v897_v53  ;;  %v418_v9 = vsel %vm410_vm14, %v1010_v13, 0.0  ;;  %v415_v53 = vsel %vm407_vm15, %v1004_v10, 0.0  ;;  %v353_v10 = vld [vmem:[#allocation2] sm:$0x1] }
  0xcd   : > { %v352_v18 = vsub.f32 %v344_v2, %v336_v16  ;;  %v367_v20 = vadd.f32 %v366_v17, %v360_v15  ;;  %v441_v22 = vsel %vm419_vm0, %v418_v9, 0.0  ;;  %v432_v24 = vsel %vm419_vm0, %v415_v53, 0.0 }
  0xce   : > { %436 = vadd.xlane.f32.xlu1 %v435_v19  ;;  %vm548_vm0 = vcmask 7168  }
  0xcf   : > { %v361_v21 = vmul.f32 %v352_v18, %v352_v18  ;;  %427 = vadd.xlane.f32.xlu0 %v426_v48 }
  0xd1   : > { %v368_v1 = vadd.f32 %v367_v20, %v361_v21 }
  0xd2   : > { %442 = vadd.xlane.f32.xlu1 %v441_v22 }
  0xd3   : > { %v369_v23 = vrot.slane %v368_v1, 4  ;;  %433 = vadd.xlane.f32.xlu0 %v432_v24 }
  0xd5   : > { %v370_v28 = vadd.f32 %v369_v23, %v368_v1 }
  0xd7   : > { %v371_v29 = vrot.slane %v370_v28, 2  ;;  %439 = vadd.xlane.f32.xlu0 %v438_v30 }
  0xd9   : > { %v372_v13 = vadd.f32 %v371_v29, %v370_v28 }
  0xdb   : > { %v373_v33 = vrot.slane %v372_v13, 1 }
  0xdd   : > { %v374_v34 = vadd.f32 %v373_v33, %v372_v13 }
  0xdf   : > { %v375_v35 = vadd.f32 %v374_v34, %v353_v10 }
  0xe1   : > { %376 = vst [vmem:[#allocation2] sm:$0x1] %v375_v35 }
  0xe8   : > { %v380_v36 = vld [vmem:[#allocation2] sm:$0x1] }
  0xe9   : > { %v382_v37 = vsel %vm381_vm2, %v380_v36, 0.0 }
  0xea   : > { %383 = vadd.xlane.f32.xlu0 %v382_v37 }
 0x13f   : > { %v494_v40 = vpop.xlane.xlu1 %493 }
 0x140   : > { %801 = vlog2.f32 %v494_v40 }
 0x143   : > { %v503_v41 = vpop.xlane.xlu1 %502 }
 0x144   : > { %803 = vlog2.f32 %v503_v41  ;;  %v497_v14 = vpop.xlane.xlu0 %496 }
 0x145   : > { %805 = vlog2.f32 %v497_v14 }
 0x147   : > { %v509_v42 = vpop.xlane.xlu1 %508 }
 0x148   : > { %807 = vlog2.f32 %v509_v42  ;;  %v500_v43 = vpop.xlane.xlu0 %499 }
 0x149   : > { %809 = vlog2.f32 %v500_v43 }
 0x14b   : > { %v515_v46 = vpop.xlane.xlu1 %514 }
 0x14c   : > { %811 = vlog2.f32 %v515_v46  ;;  %v506_v47 = vpop.xlane.xlu0 %505 }
 0x14d   : > { %v802_v49 = vpop.eup %801  ;;  %813 = vlog2.f32 %v506_v47 }
 0x14e   : > { %v517_v50 = vmul.f32 0.6931472, %v802_v49 }
 0x14f   : > { %v425_v52 = vpop.xlane.xlu1 %424 }
 0x150   : > { %v512_v54 = vpop.xlane.xlu0 %511  ;;  %v532_v6 = vadd.f32 %v517_v50, %v1024_v27 }
 0x151   : > { %v804_v55 = vpop.eup %803  ;;  %815 = vlog2.f32 %v512_v54 }
 0x152   : > { %v806_v58 = vpop.eup %805  ;;  %v523_v59 = vmul.f32 0.6931472, %v804_v55 }
 0x153   : > { %v519_v51 = vmul.f32 0.6931472, %v806_v58  ;;  %v431_v5 = vpop.xlane.xlu1 %430 }
 0x154   : > { %v422_v61 = vpop.xlane.xlu0 %421  ;;  %v535_v4 = vadd.f32 %v523_v59, %v1030_v31 }
 0x155   : > { %v808_v62 = vpop.eup %807  ;;  %v533_v63 = vadd.f32 %v519_v51, %v1032_v32  ;;  %v540_v60 = vsub.f32 %v532_v6, %v422_v61  ;;  %v576_v6 = vshrl.u32 %v401_v56, 7 }
 0x156   : > { %v810_v0 = vpop.eup %809  ;;  %v527_v2 = vmul.f32 0.6931472, %v808_v62  ;;  %v543_v57 = vsub.f32 %v535_v4, %v431_v5 }
 0x157   : > { %v521_v7 = vmul.f32 0.6931472, %v810_v0  ;;  %v541_v8 = vsub.f32 %v533_v63, %v425_v52  ;;  %v549_v17 = vsel %vm548_vm0, %v540_v60, 0.0  ;;  %v437_v21 = vpop.xlane.xlu1 %436  ;;  %vm577_vm3 = vcmp.eq.s32.totalorder %v576_v6, 0 }
 0x158   : > { %v428_v12 = vpop.xlane.xlu0 %427  ;;  %v537_v31 = vadd.f32 %v527_v2, %v1038_v38  ;;  %v554_v22 = vsel %vm548_vm0, %v543_v57, 0.0  ;;  %vm579_vm5 = vmand %vm577_vm3, %vm578_vm4 }
 0x159   : > { %v812_v15 = vpop.eup %811  ;;  %v550_v3 = vsel %vm548_vm0, %v541_v8, 0.0  ;;  %v534_v16 = vadd.f32 %v521_v7, %v1022_v26 }
 0x15a   : > { %v814_v27 = vpop.eup %813  ;;  %v531_v32 = vmul.f32 0.6931472, %v812_v15  ;;  %v551_v20 = vadd.f32 %v550_v3, %v549_v17  ;;  %v545_v24 = vsub.f32 %v537_v31, %v437_v21 }
 0x15b   : > { %v525_v18 = vmul.f32 0.6931472, %v814_v27  ;;  %v542_v19 = vsub.f32 %v534_v16, %v428_v12  ;;  %v443_v13 = vpop.xlane.xlu1 %442 }
 0x15c   : > { %v434_v48 = vpop.xlane.xlu0 %433  ;;  %v539_v25 = vadd.f32 %v531_v32, %v1046_v44  ;;  %v558_v34 = vsel %vm548_vm0, %v545_v24, 0.0 }
 0x15d   : > { %v552_v9 = vsel %vm548_vm0, %v542_v19, 0.0  ;;  %v536_v53 = vadd.f32 %v525_v18, %v1040_v39 }
 0x15e   : > { %v816_v1 = vpop.eup %815  ;;  %v553_v26 = vadd.f32 %v552_v9, %v551_v20  ;;  %v547_v39 = vsub.f32 %v539_v25, %v443_v13 }
 0x15f   : > { %v529_v23 = vmul.f32 0.6931472, %v816_v1  ;;  %v544_v28 = vsub.f32 %v536_v53, %v434_v48 }
 0x160   : > { %v555_v29 = vadd.f32 %v554_v22, %v553_v26  ;;  %v440_v10 = vpop.xlane.xlu0 %439  ;;  %v562_v41 = vsel %vm548_vm0, %v547_v39, 0.0 }
 0x161   : > { %v556_v38 = vsel %vm548_vm0, %v544_v28, 0.0  ;;  %v538_v30 = vadd.f32 %v529_v23, %v1048_v45 }
 0x162   : > { %v557_v33 = vadd.f32 %v556_v38, %v555_v29 }
 0x163   : > { %v546_v35 = vsub.f32 %v538_v30, %v440_v10 }
 0x164   : > { %v559_v36 = vadd.f32 %v558_v34, %v557_v33 }
 0x165   : > { %v560_v37 = vsel %vm548_vm0, %v546_v35, 0.0 }
 0x166   : > { %v561_v40 = vadd.f32 %v560_v37, %v559_v36 }
 0x168   : > { %v563_v44 = vadd.f32 %v562_v41, %v561_v40 }
 0x16a   : > { %564 = vadd.xlane.f32.xlu1 %v563_v44 }
 0x173   : > { %v384_v14 = vpop.xlane.xlu0 %383 }
 0x174   : > { %v385_v42 = vrot.slane %v384_v14, 4 }
 0x176   : > { %v386_v43 = vadd.f32 %v385_v42, %v384_v14 }
 0x178   : > { %v387_v45 = vrot.slane %v386_v43, 2 }
 0x17a   : > { %v388_v46 = vadd.f32 %v387_v45, %v386_v43 }
 0x17c   : > { %v389_v47 = vrot.slane %v388_v46, 1 }
 0x17e   : > { %v390_v49 = vadd.f32 %v389_v47, %v388_v46 }
 0x180   : > { %721 = vpush %v390_v49 }
 0x1b1   : > { %s722_s26 = spop %721 }
 0x1b2   : > { %s392_s29 = smul.f32 6.0424805e-05, %s722_s26 }
 0x1f3   : > { %v565_v50 = vpop.xlane.xlu1 %564 }
 0x1f4   : > { %v566_v52 = vrot.slane %v565_v50, 4 }
 0x1f6   : > { %v567_v54 = vadd.f32 %v566_v52, %v565_v50 }
 0x1f8   : > { %v568_v55 = vrot.slane %v567_v54, 2 }
 0x1fa   : > { %v569_v58 = vadd.f32 %v568_v55, %v567_v54 }
 0x1fc   : > { %v570_v59 = vrot.slane %v569_v58, 1 }
 0x1fe   : > { %v571_v51 = vadd.f32 %v570_v59, %v569_v58 }
 0x200   : > { %723 = vpush %v571_v51 }
 0x231   : > { %s724_s30 = spop %723 }
 0x232   : > { %s573_s5 = smul.f32 7.8125e-05, %s724_s30 }
 0x234   : > { %s574_s9 = sadd.f32 %s573_s5, %s392_s29 }
 0x236   : > { %v580_v61 = vstv %s574_s9 }
 0x237   : > { %v581_v56 = vsel %vm579_vm5, %v580_v61, 0.0 }
 0x238   : > { %582 = vst [vmem:[%s254_s7] sm:$0xff] %v581_v56 }
 0x239   : > { %830 = shalt.err (!%p827_p5)
}
 0x23a   : > { %s831_s26 = scalar_lea.hbm %s1159_s12, 128  ;;  %s835_s30 = scalar_lea.hbm %s1203_s4, 256 }
 0x23b   : > { %p832_p6 = scmp.ne.s32.totalorder %s1159_s12, %s831_s26  ;;  %p836_p10 = scmp.lt.s32.totalorder %s1159_s12, %s1203_s4 }
 0x23c   : > { %p837_p11 = scmp.lt.s32.totalorder %s835_s30, %s831_s26 }
 0x23d   : > { %p833_p7 = pnand %p832_p6, %p964_p4 }
 0x23e   : > { %p838_p12 = por %p837_p11, %p836_p10 }
 0x23f   : > { %p834_p9 = pneg %p833_p7 }
 0x241   : > { %p839_p13 = pnand %p838_p12, %p834_p9 }
 0x243   : > { %842 = shalt.err (!%p839_p13)
}
 0x244   : > { %725 = dma.vmem_to_hbm [thread:$0]  (%p964_p4), %s598_s8, 128, %s1159_s12, %s584_s13  }
 0x245 PF: > { %p731_p0 = scmp.ge.s32.totalorder %s893_s20, 2  ;;  %s609_s7 = sand.u32 1, %s873_s15  }
 0x246   : > { %s610_s9 = scalar_lea.sflag [#allocation4], %s609_s7 }
 0x247   : > { %p728_p1 = pnand %p731_p0, %p971_p8 }
 0x249   : > { %p729_p2 = pneg %p728_p1 }
 0x24b   : > { %868 = dma.done.wait (%p729_p2), %s610_s9, 128  }
 0x24c   : > { %870 = vsyncadd (%p729_p2), %s610_s9, 4294967168  ;;  %s17_s20 = sadd.s32 1, %s893_s20   ;;  %s1206_s15 = smov %s877_s16 }
 0x24d   : > { %p14_p3 = scmp.ge.s32.totalorder %s17_s20, 4   ;;  %s1207_s16 = smov %s881_s17 }
 0x24e   : > { %s1208_s17 = smov %s977_s28  ;;  %s1209_s18 = smov %s889_s19 }
 0x24f   : > { %s1210_s19 = smov %s1212_s23  ;;  %16 = sbr.rel (!%p14_p3) target bundleno = 4 (0x4), region = 88 }
 0x254   :  { %615 = vsyncpa [#allocation4], 1 }
 0x255   :  { %617 = vsyncpa [#allocation4 + $0x1], 1 }

</bundles_post_ra>
